<compile_context>
chip_gen: v6e
topology: v6e:2x2x1
jax: 0.10.0
libtpu: 0.0.40
codegen_flags: <defaults>
</compile_context>

<pallas_src>
import functools

import jax
import jax.numpy as jnp
from jax.experimental import pallas as pl
from jax.experimental.pallas import tpu as pltpu


def _round_up(x, m):
    return (x + m - 1) // m * m


def _e_loss_kernel(pred_ref, label_ref, cos_ref, part_ref,
                   spp_ref, sll_ref, spl_ref,
                   *, alpha, eps, n_rows, n_cols, tb):
    i = pl.program_id(0)          # B tile ("parallel")
    j = pl.program_id(1)          # D tile (reduction axis, "arbitrary", last)

    @pl.when(j == 0)
    def _init():
        spp_ref[...] = jnp.zeros_like(spp_ref)
        sll_ref[...] = jnp.zeros_like(sll_ref)
        spl_ref[...] = jnp.zeros_like(spl_ref)

    p = pred_ref[...].astype(jnp.float32)
    l = label_ref[...].astype(jnp.float32)

    # Three per-row partial sums per tile; sum (p-l)^2 is derived at finalize.
    spp_ref[...] += jnp.sum(p * p, axis=1, keepdims=True)
    sll_ref[...] += jnp.sum(l * l, axis=1, keepdims=True)
    spl_ref[...] += jnp.sum(p * l, axis=1, keepdims=True)

    @pl.when(j == pl.num_programs(1) - 1)
    def _finalize():
        spp = spp_ref[...]
        sll = sll_ref[...]
        spl = spl_ref[...]

        # sum (p - l)^2 = sum p^2 - 2*sum p*l + sum l^2   (algebraic fusion)
        ssd = spp - 2.0 * spl + sll

        # cos = sum(p*l) / (max(|p|, eps) * max(|l|, eps)); one rsqrt on the EUP.
        inv_norms = jax.lax.rsqrt(jnp.maximum(spp, eps * eps) *
                                  jnp.maximum(sll, eps * eps))
        cos = spl * inv_norms
        cos_ref[...] = cos

        # Per-row contribution to the scalar loss; zero-padded rows masked out.
        row = i * tb + jax.lax.broadcasted_iota(jnp.int32, (tb, 1), 0)
        valid = (row < n_rows).astype(jnp.float32)
        inv_bdd = 1.0 / (float(n_rows) * float(n_cols) * float(n_cols))
        inv_b = float(alpha) / float(n_rows)
        part_ref[...] = valid * (ssd * inv_bdd + (1.0 - cos) * inv_b)


def e_loss(prediction, label, alpha=0.5, eps=1e-8):
    """Pallas equivalent of E_Loss.forward. Returns (loss scalar, cos_sim (B,))."""
    assert prediction.shape == label.shape and prediction.ndim == 2
    B, D = prediction.shape

    # --- Tile sizing (VMEM-aware) ---
    TB = min(_round_up(B, 8), 256)
    Dpad = _round_up(D, 128)
    max_td = (8 * 1024 * 1024) // (2 * 2 * 4 * TB)       # 2 inputs * 2 buffers * 4 B
    max_td = max(512, min(4096, (max_td // 128) * 128))
    nd = -(-Dpad // max_td)                              # number of D (reduction) tiles
    TD = _round_up(-(-Dpad // nd), 128)                  # lane-aligned tile width
    Dpad = TD * nd
    Bpad = _round_up(B, TB)
    nb = Bpad // TB

    if (Bpad, Dpad) != (B, D):
        # Zero padding is exact: padded columns add 0 to every sum, padded rows are
        # masked out of the loss inside the kernel and sliced off below.
        prediction = jnp.pad(prediction, ((0, Bpad - B), (0, Dpad - D)))
        label = jnp.pad(label, ((0, Bpad - B), (0, Dpad - D)))

    kernel = functools.partial(
        _e_loss_kernel, alpha=float(alpha), eps=float(eps),
        n_rows=B, n_cols=D, tb=TB)

    cos_2d, part_2d = pl.pallas_call(
        kernel,
        out_shape=(
            jax.ShapeDtypeStruct((Bpad, 1), jnp.float32),   # per-row cosine similarity
            jax.ShapeDtypeStruct((Bpad, 1), jnp.float32),   # per-row loss partials
        ),
        grid_spec=pltpu.PrefetchScalarGridSpec(
            num_scalar_prefetch=0,
            grid=(nb, nd),
            in_specs=[
                pl.BlockSpec((TB, TD), lambda i, j: (i, j)),
                pl.BlockSpec((TB, TD), lambda i, j: (i, j)),
            ],
            out_specs=(
                pl.BlockSpec((TB, 1), lambda i, j: (i, 0)),
                pl.BlockSpec((TB, 1), lambda i, j: (i, 0)),
            ),
            scratch_shapes=[
                pltpu.VMEM((TB, 1), jnp.float32),   # sum p^2 per row
                pltpu.VMEM((TB, 1), jnp.float32),   # sum l^2 per row
                pltpu.VMEM((TB, 1), jnp.float32),   # sum p*l per row
            ],
        ),
        compiler_params=pltpu.CompilerParams(
            dimension_semantics=("parallel", "arbitrary")),
    )(prediction, label)

    loss = jnp.sum(part_2d)        # O(B) epilogue; padded rows already contribute 0
    cos_sim = cos_2d[:B, 0]
    return loss, cos_sim


def _reference(prediction, label, alpha=0.5, eps=1e-8):
    p = prediction.astype(jnp.float32)
    l = label.astype(jnp.float32)
    mse = jnp.mean((p - l) ** 2) / l.shape[1]
    dot = jnp.sum(p * l, axis=1)
    cos = dot / (jnp.maximum(jnp.linalg.norm(p, axis=1), eps)
                 * jnp.maximum(jnp.linalg.norm(l, axis=1), eps))
    return mse + alpha * jnp.mean(1.0 - cos), cos


if __name__ == "__main__":
    key = jax.random.PRNGKey(0)

    # Canonical shape from the module docstring: (1, 4330); plus a ragged B>1 case.
    cases = [((1, 4330), 0.5), ((6, 517), 0.25)]
    for (B, D), alpha in cases:
        key, k1, k2 = jax.random.split(key, 3)
        prediction = jax.random.normal(k1, (B, D), dtype=jnp.float32)
        label = jax.random.normal(k2, (B, D), dtype=jnp.float32)

        loss, cos_sim = jax.block_until_ready(e_loss(prediction, label, alpha=alpha))
        ref_loss, ref_cos = _reference(prediction, label, alpha=alpha)

        assert loss.shape == () and cos_sim.shape == (B,)
        assert jnp.allclose(loss, ref_loss, rtol=1e-5, atol=1e-5), (loss, ref_loss)
        assert jnp.allclose(cos_sim, ref_cos, rtol=1e-5, atol=1e-5), (cos_sim, ref_cos)

    print("KERNEL_OK")
</pallas_src>

<mosaic_0001>
module attributes {stable_mosaic.version = 11 : i64} {
  func.func @_e_loss_kernel(%arg0: i32, %arg1: i32, %arg2: memref<8x2176xf32, #tpu.memory_space<vmem>>, %arg3: memref<8x2176xf32, #tpu.memory_space<vmem>>, %arg4: memref<8x1xf32, #tpu.memory_space<vmem>>, %arg5: memref<8x1xf32, #tpu.memory_space<vmem>>, %arg6: memref<8x1xf32, #tpu.memory_space<vmem>>, %arg7: memref<8x1xf32, #tpu.memory_space<vmem>>, %arg8: memref<8x1xf32, #tpu.memory_space<vmem>>) attributes {dimension_semantics = [#tpu.dimension_semantics<parallel>, #tpu.dimension_semantics<arbitrary>], iteration_bounds = array<i64: 1, 2>, scalar_prefetch = 0 : i64, scratch_operands = 3 : i64, tpu.core_type = #tpu.core_type<tc>, window_params = [{transform_indices = @transform_0, window_bounds = array<i64: 8, 2176>}, {transform_indices = @transform_1, window_bounds = array<i64: 8, 2176>}, {transform_indices = @transform_2, window_bounds = array<i64: 8, 1>}, {transform_indices = @transform_3, window_bounds = array<i64: 8, 1>}]} {
    %c0_i32 = arith.constant 0 : i32
    %0 = arith.cmpi eq, %arg1, %c0_i32 : i32
    %1 = arith.extui %0 : i1 to i32
    %c0_i32_0 = arith.constant 0 : i32
    %2 = arith.cmpi ne, %1, %c0_i32_0 : i32
    scf.if %2 {
      %cst_19 = arith.constant 0.000000e+00 : f32
      %26 = vector.broadcast %cst_19 : f32 to vector<8x1xf32>
      %c0_20 = arith.constant 0 : index
      %c0_21 = arith.constant 0 : index
      %27 = vector.load %arg6[%c0_20, %c0_21] : memref<8x1xf32, #tpu.memory_space<vmem>>, vector<8x1xf32>
      tpu.vector_store %arg6[%c0_20, %c0_21], %26 {strides = array<i32>} : memref<8x1xf32, #tpu.memory_space<vmem>>, vector<8x1xf32>,
      %cst_22 = arith.constant 0.000000e+00 : f32
      %28 = vector.broadcast %cst_22 : f32 to vector<8x1xf32>
      %c0_23 = arith.constant 0 : index
      %c0_24 = arith.constant 0 : index
      %29 = vector.load %arg7[%c0_23, %c0_24] : memref<8x1xf32, #tpu.memory_space<vmem>>, vector<8x1xf32>
      tpu.vector_store %arg7[%c0_23, %c0_24], %28 {strides = array<i32>} : memref<8x1xf32, #tpu.memory_space<vmem>>, vector<8x1xf32>,
      %cst_25 = arith.constant 0.000000e+00 : f32
      %30 = vector.broadcast %cst_25 : f32 to vector<8x1xf32>
      %c0_26 = arith.constant 0 : index
      %c0_27 = arith.constant 0 : index
      %31 = vector.load %arg8[%c0_26, %c0_27] : memref<8x1xf32, #tpu.memory_space<vmem>>, vector<8x1xf32>
      tpu.vector_store %arg8[%c0_26, %c0_27], %30 {strides = array<i32>} : memref<8x1xf32, #tpu.memory_space<vmem>>, vector<8x1xf32>,
    } else {
    }
    %c0 = arith.constant 0 : index
    %c0_1 = arith.constant 0 : index
    %3 = vector.load %arg2[%c0, %c0_1] : memref<8x2176xf32, #tpu.memory_space<vmem>>, vector<8x2176xf32>
    %c0_2 = arith.constant 0 : index
    %c0_3 = arith.constant 0 : index
    %4 = vector.load %arg3[%c0_2, %c0_3] : memref<8x2176xf32, #tpu.memory_space<vmem>>, vector<8x2176xf32>
    %c0_4 = arith.constant 0 : index
    %c0_5 = arith.constant 0 : index
    %5 = vector.load %arg6[%c0_4, %c0_5] : memref<8x1xf32, #tpu.memory_space<vmem>>, vector<8x1xf32>
    %6 = arith.mulf %3, %3 : vector<8x2176xf32>
    %cst = arith.constant dense<0.000000e+00> : vector<8xf32>
    %7 = vector.multi_reduction <add>, %6, %cst [1] : vector<8x2176xf32> to vector<8xf32>
    %8 = vector.shape_cast %7 : vector<8xf32> to vector<8x1xf32>
    %9 = arith.addf %5, %8 : vector<8x1xf32>
    %c0_6 = arith.constant 0 : index
    %c0_7 = arith.constant 0 : index
    %10 = vector.load %arg6[%c0_6, %c0_7] : memref<8x1xf32, #tpu.memory_space<vmem>>, vector<8x1xf32>
    tpu.vector_store %arg6[%c0_6, %c0_7], %9 {strides = array<i32>} : memref<8x1xf32, #tpu.memory_space<vmem>>, vector<8x1xf32>,
    %c0_8 = arith.constant 0 : index
    %c0_9 = arith.constant 0 : index
    %11 = vector.load %arg7[%c0_8, %c0_9] : memref<8x1xf32, #tpu.memory_space<vmem>>, vector<8x1xf32>
    %12 = arith.mulf %4, %4 : vector<8x2176xf32>
    %cst_10 = arith.constant dense<0.000000e+00> : vector<8xf32>
    %13 = vector.multi_reduction <add>, %12, %cst_10 [1] : vector<8x2176xf32> to vector<8xf32>
    %14 = vector.shape_cast %13 : vector<8xf32> to vector<8x1xf32>
    %15 = arith.addf %11, %14 : vector<8x1xf32>
    %c0_11 = arith.constant 0 : index
    %c0_12 = arith.constant 0 : index
    %16 = vector.load %arg7[%c0_11, %c0_12] : memref<8x1xf32, #tpu.memory_space<vmem>>, vector<8x1xf32>
    tpu.vector_store %arg7[%c0_11, %c0_12], %15 {strides = array<i32>} : memref<8x1xf32, #tpu.memory_space<vmem>>, vector<8x1xf32>,
    %c0_13 = arith.constant 0 : index
    %c0_14 = arith.constant 0 : index
    %17 = vector.load %arg8[%c0_13, %c0_14] : memref<8x1xf32, #tpu.memory_space<vmem>>, vector<8x1xf32>
    %18 = arith.mulf %3, %4 : vector<8x2176xf32>
    %cst_15 = arith.constant dense<0.000000e+00> : vector<8xf32>
    %19 = vector.multi_reduction <add>, %18, %cst_15 [1] : vector<8x2176xf32> to vector<8xf32>
    %20 = vector.shape_cast %19 : vector<8xf32> to vector<8x1xf32>
    %21 = arith.addf %17, %20 : vector<8x1xf32>
    %c0_16 = arith.constant 0 : index
    %c0_17 = arith.constant 0 : index
    %22 = vector.load %arg8[%c0_16, %c0_17] : memref<8x1xf32, #tpu.memory_space<vmem>>, vector<8x1xf32>
    tpu.vector_store %arg8[%c0_16, %c0_17], %21 {strides = array<i32>} : memref<8x1xf32, #tpu.memory_space<vmem>>, vector<8x1xf32>,
    %c1_i32 = arith.constant 1 : i32
    %23 = arith.cmpi eq, %arg1, %c1_i32 : i32
    %24 = arith.extui %23 : i1 to i32
    %c0_i32_18 = arith.constant 0 : i32
    %25 = arith.cmpi ne, %24, %c0_i32_18 : i32
    scf.if %25 {
      %c0_19 = arith.constant 0 : index
      %c0_20 = arith.constant 0 : index
      %26 = vector.load %arg6[%c0_19, %c0_20] : memref<8x1xf32, #tpu.memory_space<vmem>>, vector<8x1xf32>
      %c0_21 = arith.constant 0 : index
      %c0_22 = arith.constant 0 : index
      %27 = vector.load %arg7[%c0_21, %c0_22] : memref<8x1xf32, #tpu.memory_space<vmem>>, vector<8x1xf32>
      %c0_23 = arith.constant 0 : index
      %c0_24 = arith.constant 0 : index
      %28 = vector.load %arg8[%c0_23, %c0_24] : memref<8x1xf32, #tpu.memory_space<vmem>>, vector<8x1xf32>
      %cst_25 = arith.constant 2.000000e+00 : f32
      %29 = vector.broadcast %cst_25 : f32 to vector<8x1xf32>
      %30 = arith.mulf %29, %28 : vector<8x1xf32>
      %31 = arith.subf %26, %30 : vector<8x1xf32>
      %32 = arith.addf %31, %27 : vector<8x1xf32>
      %cst_26 = arith.constant 1.000000e-16 : f32
      %33 = vector.broadcast %cst_26 : f32 to vector<8x1xf32>
      %34 = arith.maximumf %26, %33 : vector<8x1xf32>
      %cst_27 = arith.constant 1.000000e-16 : f32
      %35 = vector.broadcast %cst_27 : f32 to vector<8x1xf32>
      %36 = arith.maximumf %27, %35 : vector<8x1xf32>
      %37 = arith.mulf %34, %36 : vector<8x1xf32>
      %38 = math.rsqrt %37 : vector<8x1xf32>
      %39 = arith.mulf %28, %38 : vector<8x1xf32>
      %c0_28 = arith.constant 0 : index
      %c0_29 = arith.constant 0 : index
      %40 = vector.load %arg4[%c0_28, %c0_29] : memref<8x1xf32, #tpu.memory_space<vmem>>, vector<8x1xf32>
      tpu.vector_store %arg4[%c0_28, %c0_29], %39 {strides = array<i32>} : memref<8x1xf32, #tpu.memory_space<vmem>>, vector<8x1xf32>,
      %c8_i32 = arith.constant 8 : i32
      %41 = arith.muli %arg0, %c8_i32 : i32
      %42 = tpu.iota {dimensions = array<i32: 0>} : vector<8x1xi32>
      %43 = vector.broadcast %41 : i32 to vector<8x1xi32>
      %44 = arith.addi %43, %42 : vector<8x1xi32>
      %c1_i32_30 = arith.constant 1 : i32
      %45 = vector.broadcast %c1_i32_30 : i32 to vector<8x1xi32>
      %46 = arith.cmpi slt, %44, %45 : vector<8x1xi32>
      %47 = arith.extui %46 : vector<8x1xi1> to vector<8x1xi32>
      %48 = arith.sitofp %47 : vector<8x1xi32> to vector<8x1xf32>
      %cst_31 = arith.constant 5.33364641E-8 : f32
      %49 = vector.broadcast %cst_31 : f32 to vector<8x1xf32>
      %50 = arith.mulf %32, %49 : vector<8x1xf32>
      %cst_32 = arith.constant 1.000000e+00 : f32
      %51 = vector.broadcast %cst_32 : f32 to vector<8x1xf32>
      %52 = arith.subf %51, %39 : vector<8x1xf32>
      %cst_33 = arith.constant 5.000000e-01 : f32
      %53 = vector.broadcast %cst_33 : f32 to vector<8x1xf32>
      %54 = arith.mulf %52, %53 : vector<8x1xf32>
      %55 = arith.addf %50, %54 : vector<8x1xf32>
      %56 = arith.mulf %48, %55 : vector<8x1xf32>
      %c0_34 = arith.constant 0 : index
      %c0_35 = arith.constant 0 : index
      %57 = vector.load %arg5[%c0_34, %c0_35] : memref<8x1xf32, #tpu.memory_space<vmem>>, vector<8x1xf32>
      tpu.vector_store %arg5[%c0_34, %c0_35], %56 {strides = array<i32>} : memref<8x1xf32, #tpu.memory_space<vmem>>, vector<8x1xf32>,
    } else {
    }
    return
  }
  func.func @transform_0(%arg0: i32, %arg1: i32) -> (i32, i32) {
    %c0_i32 = arith.constant 0 : i32
    return %arg0, %arg1 : i32, i32
  }
  func.func @transform_1(%arg0: i32, %arg1: i32) -> (i32, i32) {
    %c0_i32 = arith.constant 0 : i32
    return %arg0, %arg1 : i32, i32
  }
  func.func @transform_2(%arg0: i32, %arg1: i32) -> (i32, i32) {
    %c0_i32 = arith.constant 0 : i32
    %c0_i32_0 = arith.constant 0 : i32
    return %arg0, %c0_i32 : i32, i32
  }
  func.func @transform_3(%arg0: i32, %arg1: i32) -> (i32, i32) {
    %c0_i32 = arith.constant 0 : i32
    %c0_i32_0 = arith.constant 0 : i32
    return %arg0, %c0_i32 : i32, i32
  }
}

</mosaic_0001>

<bundles_post_ra>
// kernel: tpu_custom_call.1
= control target key start
LH: loop header
LB: loop body
LE: loop exit
PB: predicated region body
PF: predicated region fallthrough
CT: control target
= control target key end

     0   :  { %9 = vsyncpa [#allocation6], 0  ;;  %s956_s0 = inlined_call_operand.hbm [shape: f32[8,4352], index: 0, kind: input, shape index: {}]   ;;  %s957_s1 = inlined_call_operand.hbm [shape: f32[8,4352], index: 1, kind: input, shape index: {}]   ;;  %s958_s2 = inlined_call_operand.vmem [shape: f32[8,1], index: 2, kind: output, shape index: {0}]   ;;  %s959_s3 = inlined_call_operand.vmem [shape: f32[8,1], index: 3, kind: output, shape index: {1}]  }
   0x1   :  { %11 = vsyncpa [#allocation6 + $0x1], 0 }
   0x2   :  { %12 = vsyncpa [#allocation8], 0 }
   0x3   :  { %14 = vsyncpa [#allocation8 + $0x1], 0  ;;  %s790_s12 = smov 0   ;;  %s792_s13 = smov 0  }
   0x4   :  { %s794_s14 = smov 0   ;;  %s796_s15 = smov 0  }
   0x5   :  { %s798_s16 = smov 0   ;;  %s800_s17 = smov 0  }
   0x6 LB: > { %s572_s18 = sadd.s32 4294967295, %s764_s17   ;;  %s29_s19 = sadd.s32 1, %s760_s16  ;;  %s764_s17 = sphi %s800_s17, %s20_s17   ;;  %s760_s16 = sphi %s798_s16, %s967_s16   ;;  %s756_s15 = sphi %s796_s15, %s966_s15   ;;  %s752_s14 = sphi %s794_s14, %s965_s14   ;;  %s748_s13 = sphi %s792_s13, %s964_s13   ;;  %s744_s12 = sphi %s790_s12, %s963_s12  }
   0x7   : > { %p30_p0 = scmp.ge.s32.totalorder %s29_s19, 2  ;;  %s41_s20 = sadd.s32 1, %s752_s14 }
   0x8   : > { %p48_p1 = scmp.ne.s32.totalorder %s752_s14, %s748_s13  ;;  %p49_p2 = scmp.eq.s32.totalorder %s764_s17, 0 }
   0x9   : > { %s969_s19 = smov (%p30_p0, %s29_s19), 0  ;;  %p54_p4 = scmp.ne.s32.totalorder %s748_s13, %s744_s12 }
   0xa   : > { %p50_p3 = por %p49_p2, %p48_p1  ;;  %s37_s21 = ssub.s32 %s760_s16, %s969_s19 }
   0xb   : > { %p55_p5 = scmp.eq.s32.totalorder %s572_s18, 0  ;;  %p39_p6 = scmp.eq.s32.totalorder %s37_s21, 0 }
   0xc   : > { %p601_p8 = scmp.lt.s32.totalorder %s764_s17, 2  ;;  %s838_s24 = sand.u32 1, %s752_s14  }
   0xd   : > { %p829_p7 = por %p55_p5, %p54_p4  ;;  %s585_s25 = smul.u32 2176, %s760_s16 }
   0xe   : > { %s835_s23 = scalar_select %p39_p6, %s752_s14, %s41_s20  }
   0xf   : > { %s587_s26 = smul.u32 136, %s838_s24  ;;  %s170_s29 = scalar_lea.hbm %s956_s0, %s585_s25 }
  0x10   : > { %p845_p9 = pnand %p601_p8, %p50_p3  ;;  %p577_p10 = scmp.ge.s32.totalorder %s764_s17, 1 }
  0x11   : > { %s162_s4 = scalar_lea.vmem [#allocation5], %s587_s26  ;;  %p198_p11 = scmp.lt.s32.totalorder %s764_s17, 3 }
  0x12   : > { %s172_s5 = sshll.u32 %s162_s4, 4  ;;  %s159_s6 = scalar_lea.sflag [#allocation6], %s838_s24  ;;  %s173_s5 = int_to_ptr.vmem [resolvable:$true] %s172_s5 }
  0x13   : > { %p656_p12 = pneg %p845_p9  ;;  %s667_s7 = scalar_lea.vmem %s173_s5, 2176 }
  0x14   : > { %p668_p13 = scmp.ne.s32.totalorder %s173_s5, %s667_s7  ;;  %s766_s8 = smov [#allocation5]  }
  0x15   : > { %s672_s9 = sshll.u32 %s766_s8, 4  ;;  %s673_s9 = int_to_ptr.vmem [resolvable:$false] %s672_s9 }
  0x16   : > { %p670_p0 = pnand %p668_p13, %p656_p12  ;;  %s674_s10 = scalar_lea.vmem %s673_s9, 4352 }
  0x17   : > { %p675_p2 = scmp.lt.s32.totalorder %s173_s5, %s673_s9  ;;  %p676_p3 = scmp.lt.s32.totalorder %s674_s10, %s667_s7 }
  0x18   : > { %p671_p1 = pneg %p670_p0 }
  0x19   : > { %p677_p4 = por %p676_p3, %p675_p2 }
  0x1b   : > { %p678_p5 = pnand %p677_p4, %p671_p1 }
  0x1d   : > { %681 = shalt.err (!%p678_p5)
}
  0x1e   : > { %597 = dma.hbm_to_vmem [thread:$0]  (!%p845_p9), %s170_s29, 2176, %s173_s5, %s159_s6  }
  0x1f   : > { %p863_p6 = pnand %p577_p10, %p198_p11  ;;  %s191_s20 = scalar_lea.hbm %s957_s1, %s585_s25 }
  0x20   : > { %s183_s21 = scalar_lea.vmem [#allocation7], %s587_s26  ;;  %s180_s28 = scalar_lea.sflag [#allocation8], %s838_s24 }
  0x21   : > { %s193_s27 = sshll.u32 %s183_s21, 4  ;;  %s767_s29 = smov [#allocation7]   ;;  %s194_s27 = int_to_ptr.vmem [resolvable:$true] %s193_s27 }
  0x22   : > { %s695_s4 = scalar_lea.vmem %s194_s27, 2176  ;;  %s700_s5 = sshll.u32 %s767_s29, 4  ;;  %s701_s5 = int_to_ptr.vmem [resolvable:$false] %s700_s5 }
  0x23   : > { %p696_p8 = scmp.ne.s32.totalorder %s194_s27, %s695_s4  ;;  %s702_s6 = scalar_lea.vmem %s701_s5, 4352 }
  0x24   : > { %p703_p10 = scmp.lt.s32.totalorder %s194_s27, %s701_s5  ;;  %p704_p11 = scmp.lt.s32.totalorder %s702_s6, %s695_s4 }
  0x25   : > { %p698_p13 = pnand %p696_p8, %p656_p12 }
  0x26   : > { %p705_p1 = por %p704_p11, %p703_p10 }
  0x27   : > { %p699_p0 = pneg %p698_p13 }
  0x29   : > { %p706_p2 = pnand %p705_p1, %p699_p0 }
  0x2b   : > { %709 = shalt.err (!%p706_p2)
}
  0x2c   : > { %600 = dma.hbm_to_vmem [thread:$0]  (!%p845_p9), %s191_s20, 2176, %s194_s27, %s180_s28  }
  0x2d   : > { %202 = sbr.rel (%p863_p6) target bundleno = 280 (0x118), region = 28  ;;  %s204_s24 = sand.u32 (!%p863_p6), 1, %s748_s13  }
  0x2e   : > { %s589_s25 = smul.u32 (!%p863_p6), 136, %s204_s24  ;;  %s205_s26 = scalar_lea.sflag (!%p863_p6), [#allocation6], %s204_s24 }
  0x30   : > { %s879_s7 = scalar_lea.vmem (!%p863_p6), [#allocation5], %s589_s25 }
  0x32   : > { %735 = dma.done.wait (%p829_p7), %s205_s26, 2176  }
  0x33   : > { %737 = vsyncadd (%p829_p7), %s205_s26, 4294965120  ;;  %s214_s8 = scalar_lea.sflag [#allocation8], %s204_s24  ;;  %s885_s9 = scalar_lea.vmem [#allocation7], %s589_s25 }
  0x34   : > { %739 = dma.done.wait (%p829_p7), %s214_s8, 2176  }
  0x35   : > { %741 = vsyncadd (%p829_p7), %s214_s8, 4294965120  ;;  %p578_p9 = scmp.ne.s32.totalorder %s756_s15, 0 }
  0x37   : > { %261 = sbr.rel (%p578_p9) target bundleno = 63 (0x3f), region = 40 }
  0x3c   : > { %vm262_vm0 = vcmask 7168   ;;  %v768_v0 = vmov 0.0  }
  0x3d   : > { %263 = vst.msk [vmem:[#allocation2] sm:$0xff] %vm262_vm0, %v768_v0  ;;  %264 = vst.msk [vmem:[#allocation3] sm:$0xff] %vm262_vm0, %v768_v0 }
  0x3e   : > { %265 = vst.msk [vmem:[#allocation4] sm:$0xff] %vm262_vm0, %v768_v0 }
  0x3f PF: > { %v266_v1 = vld [vmem:[%s879_s7] sm:$0xff]  ;;  %v267_v2 = vld [vmem:[%s879_s7 + $0x8] sm:$0xff]  ;;  %v268_v3 = vld [vmem:[%s879_s7 + $0x10] sm:$0xff]  ;;  %vm337_vm1 = vcmask 7168   ;;  %p579_p7 = scmp.ne.s32.totalorder %s756_s15, 1 }
  0x40   : > { %v269_v4 = vld [vmem:[%s879_s7 + $0x18] sm:$0xff]  ;;  %v301_v5 = vmul.f32 %v266_v1, %v266_v1  ;;  %v302_v6 = vmul.f32 %v267_v2, %v267_v2  ;;  %v303_v7 = vmul.f32 %v268_v3, %v268_v3  ;;  %v270_v8 = vld [vmem:[%s879_s7 + $0x20] sm:$0xff]  ;;  %v271_v11 = vld [vmem:[%s879_s7 + $0x28] sm:$0xff] }
  0x41   : > { %v304_v9 = vmul.f32 %v269_v4, %v269_v4  ;;  %v305_v12 = vmul.f32 %v270_v8, %v270_v8  ;;  %v283_v14 = vld [vmem:[%s885_s9] sm:$0xff]  ;;  %v284_v16 = vld [vmem:[%s885_s9 + $0x8] sm:$0xff]  ;;  %v285_v17 = vld [vmem:[%s885_s9 + $0x10] sm:$0xff]  ;;  %v306_v19 = vmul.f32 %v271_v11, %v271_v11 }
  0x42   : > { %v318_v10 = vadd.f32 %v302_v6, %v301_v5  ;;  %v272_v15 = vld [vmem:[%s879_s7 + $0x30] sm:$0xff]  ;;  %v378_v18 = vmul.f32 %v283_v14, %v266_v1  ;;  %v286_v21 = vld [vmem:[%s885_s9 + $0x18] sm:$0xff]  ;;  %v379_v22 = vmul.f32 %v284_v16, %v267_v2  ;;  %v273_v23 = vld [vmem:[%s879_s7 + $0x38] sm:$0xff]  ;;  %v380_v24 = vmul.f32 %v285_v17, %v268_v3 }
  0x43   : > { %v307_v25 = vmul.f32 %v272_v15, %v272_v15  ;;  %v287_v27 = vld [vmem:[%s885_s9 + $0x20] sm:$0xff]  ;;  %v274_v28 = vld [vmem:[%s879_s7 + $0x40] sm:$0xff]  ;;  %v381_v29 = vmul.f32 %v286_v21, %v269_v4  ;;  %v308_v31 = vmul.f32 %v273_v23, %v273_v23  ;;  %v288_v33 = vld [vmem:[%s885_s9 + $0x28] sm:$0xff]  ;;  %v340_v40 = vmul.f32 %v283_v14, %v283_v14 }
  0x44   : > { %v319_v13 = vadd.f32 %v318_v10, %v303_v7  ;;  %v395_v30 = vadd.f32 %v379_v22, %v378_v18  ;;  %v275_v34 = vld [vmem:[%s879_s7 + $0x48] sm:$0xff]  ;;  %v382_v35 = vmul.f32 %v287_v27, %v270_v8  ;;  %v309_v37 = vmul.f32 %v274_v28, %v274_v28  ;;  %v289_v39 = vld [vmem:[%s885_s9 + $0x30] sm:$0xff]  ;;  %v276_v42 = vld [vmem:[%s879_s7 + $0x50] sm:$0xff] }
  0x45   : > { %v341_v41 = vmul.f32 %v284_v16, %v284_v16  ;;  %v383_v43 = vmul.f32 %v288_v33, %v271_v11  ;;  %v310_v45 = vmul.f32 %v275_v34, %v275_v34  ;;  %v290_v47 = vld [vmem:[%s885_s9 + $0x38] sm:$0xff]  ;;  %v342_v48 = vmul.f32 %v285_v17, %v285_v17  ;;  %v277_v49 = vld [vmem:[%s879_s7 + $0x58] sm:$0xff]  ;;  %v291_v54 = vld [vmem:[%s885_s9 + $0x40] sm:$0xff] }
  0x46   : > { %v320_v20 = vadd.f32 %v319_v13, %v304_v9  ;;  %v396_v36 = vadd.f32 %v395_v30, %v380_v24  ;;  %v384_v50 = vmul.f32 %v289_v39, %v272_v15  ;;  %v311_v52 = vmul.f32 %v276_v42, %v276_v42  ;;  %v278_v57 = vld [vmem:[%s879_s7 + $0x60] sm:$0xff]  ;;  %v292_v62 = vld [vmem:[%s885_s9 + $0x48] sm:$0xff]  ;;  %v279_v1 = vld [vmem:[%s879_s7 + $0x68] sm:$0xff] }
  0x47   : > { %v343_v55 = vmul.f32 %v286_v21, %v286_v21  ;;  %v357_v56 = vadd.f32 %v341_v41, %v340_v40  ;;  %v385_v58 = vmul.f32 %v290_v47, %v273_v23  ;;  %v312_v60 = vmul.f32 %v277_v49, %v277_v49  ;;  %v293_v6 = vld [vmem:[%s885_s9 + $0x50] sm:$0xff]  ;;  %v280_v9 = vld [vmem:[%s879_s7 + $0x70] sm:$0xff]  ;;  %v294_v14 = vld [vmem:[%s885_s9 + $0x58] sm:$0xff] }
  0x48   : > { %v321_v26 = vadd.f32 %v320_v20, %v305_v12  ;;  %v397_v44 = vadd.f32 %v396_v36, %v381_v29  ;;  %v344_v63 = vmul.f32 %v287_v27, %v287_v27  ;;  %v386_v2 = vmul.f32 %v291_v54, %v274_v28  ;;  %v281_v17 = vld [vmem:[%s879_s7 + $0x78] sm:$0xff]  ;;  %v295_v22 = vld [vmem:[%s885_s9 + $0x60] sm:$0xff] }
  0x49   : > { %v358_v0 = vadd.f32 %v357_v56, %v342_v48  ;;  %v313_v4 = vmul.f32 %v278_v57, %v278_v57  ;;  %v345_v7 = vmul.f32 %v288_v33, %v288_v33  ;;  %v387_v10 = vmul.f32 %v292_v62, %v275_v34  ;;  %v296_v30 = vld [vmem:[%s885_s9 + $0x68] sm:$0xff] }
  0x4a   : > { %v322_v32 = vadd.f32 %v321_v26, %v306_v19  ;;  %v398_v51 = vadd.f32 %v397_v44, %v382_v35  ;;  %v314_v12 = vmul.f32 %v279_v1, %v279_v1  ;;  %v346_v15 = vmul.f32 %v289_v39, %v289_v39 }
  0x4b   : > { %v359_v8 = vadd.f32 %v358_v0, %v343_v55  ;;  %v388_v18 = vmul.f32 %v293_v6, %v276_v42  ;;  %v315_v20 = vmul.f32 %v280_v9, %v280_v9  ;;  %v347_v23 = vmul.f32 %v290_v47, %v290_v47 }
  0x4c   : > { %v323_v38 = vadd.f32 %v322_v32, %v307_v25  ;;  %v399_v59 = vadd.f32 %v398_v51, %v383_v43  ;;  %v282_v25 = vld [vmem:[%s879_s7 + $0x80] sm:$0xff]  ;;  %v389_v26 = vmul.f32 %v294_v14, %v277_v49  ;;  %v316_v28 = vmul.f32 %v281_v17, %v281_v17  ;;  %v298_v43 = vld [vmem:[%s885_s9 + $0x78] sm:$0xff]  ;;  %v299_v49 = vld [vmem:[%s885_s9 + $0x80] sm:$0xff] }
  0x4d   : > { %v360_v16 = vadd.f32 %v359_v8, %v344_v63  ;;  %v390_v33 = vmul.f32 %v295_v22, %v278_v57  ;;  %v317_v35 = vmul.f32 %v282_v25, %v282_v25  ;;  %v391_v40 = vmul.f32 %v296_v30, %v279_v1 }
  0x4e   : > { %v324_v46 = vadd.f32 %v323_v38, %v308_v31  ;;  %v400_v3 = vadd.f32 %v399_v59, %v384_v50  ;;  %v348_v31 = vmul.f32 %v291_v54, %v291_v54  ;;  %v349_v38 = vmul.f32 %v292_v62, %v292_v62 }
  0x4f   : > { %v361_v24 = vadd.f32 %v360_v16, %v345_v7  ;;  %v350_v44 = vmul.f32 %v293_v6, %v293_v6  ;;  %v351_v50 = vmul.f32 %v294_v14, %v294_v14  ;;  %v352_v54 = vmul.f32 %v295_v22, %v295_v22  ;;  %v300_v6 = vld [vmem:[#allocation2] sm:$0xff] }
  0x50   : > { %v325_v53 = vadd.f32 %v324_v46, %v309_v37  ;;  %v401_v11 = vadd.f32 %v400_v3, %v385_v58  ;;  %v297_v37 = vld [vmem:[%s885_s9 + $0x70] sm:$0xff]  ;;  %v394_v56 = vmul.f32 %v299_v49, %v282_v25  ;;  %v353_v58 = vmul.f32 %v296_v30, %v296_v30 }
  0x51   : > { %v362_v32 = vadd.f32 %v361_v24, %v346_v15  ;;  %v392_v46 = vmul.f32 %v297_v37, %v280_v9  ;;  %v355_v0 = vmul.f32 %v298_v43, %v298_v43  ;;  %v377_v9 = vld [vmem:[#allocation4] sm:$0xff] }
  0x52   : > { %v326_v61 = vadd.f32 %v325_v53, %v310_v45  ;;  %v402_v19 = vadd.f32 %v401_v11, %v386_v2  ;;  %v356_v2 = vmul.f32 %v299_v49, %v299_v49 }
  0x53   : > { %v363_v39 = vadd.f32 %v362_v32, %v347_v23 }
  0x54   : > { %v327_v5 = vadd.f32 %v326_v61, %v311_v52  ;;  %v403_v27 = vadd.f32 %v402_v19, %v387_v10  ;;  %v393_v52 = vmul.f32 %v298_v43, %v281_v17  ;;  %v354_v61 = vmul.f32 %v297_v37, %v297_v37 }
  0x55   : > { %v364_v45 = vadd.f32 %v363_v39, %v348_v31 }
  0x56   : > { %v328_v13 = vadd.f32 %v327_v5, %v312_v60  ;;  %v404_v34 = vadd.f32 %v403_v27, %v388_v18 }
  0x57   : > { %v365_v51 = vadd.f32 %v364_v45, %v349_v38 }
  0x58   : > { %v329_v21 = vadd.f32 %v328_v13, %v313_v4  ;;  %v405_v41 = vadd.f32 %v404_v34, %v389_v26 }
  0x59   : > { %v366_v55 = vadd.f32 %v365_v51, %v350_v44 }
  0x5a   : > { %v330_v29 = vadd.f32 %v329_v21, %v314_v12  ;;  %v406_v47 = vadd.f32 %v405_v41, %v390_v33  ;;  %v339_v12 = vld [vmem:[#allocation3] sm:$0xff] }
  0x5b   : > { %v367_v59 = vadd.f32 %v366_v55, %v351_v50 }
  0x5c   : > { %v331_v36 = vadd.f32 %v330_v29, %v315_v20  ;;  %v407_v53 = vadd.f32 %v406_v47, %v391_v40 }
  0x5d   : > { %v368_v62 = vadd.f32 %v367_v59, %v352_v54 }
  0x5e   : > { %v332_v42 = vadd.f32 %v331_v36, %v316_v28  ;;  %v408_v57 = vadd.f32 %v407_v53, %v392_v46 }
  0x5f   : > { %v369_v1 = vadd.f32 %v368_v62, %v353_v58 }
  0x60   : > { %v333_v48 = vadd.f32 %v332_v42, %v317_v35  ;;  %v409_v60 = vadd.f32 %v408_v57, %v393_v52 }
  0x61   : > { %v370_v3 = vadd.f32 %v369_v1, %v354_v61 }
  0x62   : > { %334 = vadd.xlane.f32.xlu0 %v333_v48  ;;  %v410_v63 = vadd.f32 %v409_v60, %v394_v56 }
  0x63   : > { %v371_v4 = vadd.f32 %v370_v3, %v355_v0 }
  0x64   : > { %411 = vadd.xlane.f32.xlu1 %v410_v63 }
  0x65   : > { %v372_v5 = vadd.f32 %v371_v4, %v356_v2 }
  0x67   : > { %373 = vadd.xlane.f32.xlu0 %v372_v5 }
  0xeb   : > { %v335_v7 = vpop.xlane.xlu0 %334 }
  0xec   : > { %v336_v8 = vadd.f32 %v335_v7, %v300_v6 }
  0xed   : > { %v412_v10 = vpop.xlane.xlu1 %411 }
  0xee   : > { %338 = vst.msk [vmem:[#allocation2] sm:$0xff] %vm337_vm1, %v336_v8  ;;  %v413_v11 = vadd.f32 %v412_v10, %v377_v9 }
  0xef   : > { %418 = sbr.rel (%p579_p7) target bundleno = 280 (0x118), region = 44 }
  0xf0   : > { %414 = vst.msk [vmem:[#allocation4] sm:$0xff] %vm337_vm1, %v413_v11  ;;  %v374_v13 = vpop.xlane.xlu0 %373 }
  0xf1   : > { %v375_v14 = vadd.f32 %v374_v13, %v339_v12 }
  0xf3   : > { %376 = vst.msk [vmem:[#allocation3] sm:$0xff] %vm337_vm1, %v375_v14 }
  0xf4   : > { %v432_v23 = vlaneseq  ;;  %v769_v31 = vmov 0.0  }
  0xf5   : > { %v419_v15 = vld [vmem:[#allocation2] sm:$0xff] }
  0xf6   : > { %v425_v17 = vmax.f32 %v419_v15, 1e-16  ;;  %v433_v25 = vshrl.u32 %v432_v23, 7 }
  0xf7   : > { %v421_v20 = vld [vmem:[#allocation4] sm:$0xff] }
  0xf8   : > { %v422_v21 = vmul.f32 2.0, %v421_v20  ;;  %vm436_vm2 = vcmp.lt.s32.totalorder %v433_v25, 1 }
  0xf9   : > { %v580_v32 = vsel %vm436_vm2, 1.0, %v769_v31 }
  0xfa   : > { %v420_v16 = vld [vmem:[#allocation3] sm:$0xff]  ;;  %v423_v22 = vsub.f32 %v419_v15, %v422_v21 }
  0xfb   : > { %v426_v18 = vmax.f32 %v420_v16, 1e-16 }
  0xfc   : > { %v424_v24 = vadd.f32 %v423_v22, %v420_v16 }
  0xfd   : > { %v427_v19 = vmul.f32 %v426_v18, %v425_v17 }
  0xfe   : > { %v439_v29 = vmul.f32 5.3336464e-08, %v424_v24 }
  0xff   : > { %652 = vrsqrt.f32 %v427_v19 }
 0x10c   : > { %v653_v26 = vpop.eup %652 }
 0x10d   : > { %v429_v27 = vmul.f32 %v653_v26, %v421_v20 }
 0x10f   : > { %430 = vst.msk [vmem:[%s958_s2] sm:$0xff] %vm337_vm1, %v429_v27  ;;  %v440_v28 = vsub.f32 1.0, %v429_v27 }
 0x111   : > { %v441_v30 = vmul.f32 0.5, %v440_v28 }
 0x113   : > { %v442_v33 = vadd.f32 %v441_v30, %v439_v29 }
 0x115   : > { %v443_v34 = vmul.f32 %v580_v32, %v442_v33 }
 0x117   : > { %444 = vst.msk [vmem:[%s959_s3] sm:$0xff] %vm337_vm1, %v443_v34 }
 0x118 PF: > { %s20_s17 = sadd.s32 1, %s764_s17   ;;  %s963_s12 = smov %s748_s13 }
 0x119   : > { %p17_p12 = scmp.ge.s32.totalorder %s20_s17, 4   ;;  %s964_s13 = smov %s752_s14 }
 0x11a   : > { %s965_s14 = smov %s835_s23  ;;  %s966_s15 = smov %s760_s16 }
 0x11b   : > { %s967_s16 = smov %s969_s19  ;;  %19 = sbr.rel (!%p17_p12) target bundleno = 6 (0x6), region = 101 }
 0x120   :  { %478 = vsyncpa [#allocation6], 1 }
 0x121   :  { %480 = vsyncpa [#allocation6 + $0x1], 1 }
 0x122   :  { %481 = vsyncpa [#allocation8], 1 }
 0x123   :  { %483 = vsyncpa [#allocation8 + $0x1], 1 }

</bundles_post_ra>
